<compile_context>
chip_gen: v7x
topology: tpu7x:2x2x1
jax: 0.10.0
libtpu: 0.0.40
codegen_flags: <defaults>
</compile_context>

<pallas_src>
import jax
import jax.numpy as jnp
import numpy as np
from jax.experimental import pallas as pl
from jax.experimental.pallas import tpu as pltpu


# -----------------------------------------------------------------------------
# kernels
# -----------------------------------------------------------------------------

def _qkv_proj_kernel(x_ref, wq_ref, bq_ref, wk_ref, bk_ref, wv_ref, bv_ref,
                     q_ref, k_ref, v_ref):
    """q/k/v projections for one (tq, D) slab of activations (bf16 in, f32 acc)."""
    x = x_ref[...]
    q = jnp.dot(x, wq_ref[...], preferred_element_type=jnp.float32) + bq_ref[...]
    k = jnp.dot(x, wk_ref[...], preferred_element_type=jnp.float32) + bk_ref[...]
    v = jnp.dot(x, wv_ref[...], preferred_element_type=jnp.float32) + bv_ref[...]
    q_ref[...] = q.astype(q_ref.dtype)
    k_ref[...] = k.astype(k_ref.dtype)
    v_ref[...] = v.astype(v_ref.dtype)


def _colstats_kernel(q_ref, k_ref, m_ref, r_ref, m_run, d_run):
    """Per-key-COLUMN softmax stats (softmax in the module is over dim=1 = query).

    Grid = (B, num_key_tiles, num_query_tiles); the query axis is the inner
    reduction.  A running column max / rescaled column sum is carried across
    query tiles in (1, tk) VMEM scratch and finalized at the last query tile.
    Stats are stored with keys on the LANE axis so the attention kernel can
    broadcast them without any transpose.
    """
    qi = pl.program_id(2)
    nq = pl.num_programs(2)

    @pl.when(qi == 0)
    def _init():
        m_run[...] = jnp.full_like(m_run, -jnp.inf)
        d_run[...] = jnp.zeros_like(d_run)

    # scores[i, j] = q[i, :] . k[j, :]  -> (tq, tk); H-contracted dot_general,
    # same formulation as the flash-attention reference kernel (no explicit k.T).
    s = jax.lax.dot_general(q_ref[...], k_ref[...],
                            dimension_numbers=(((1,), (1,)), ((), ())),
                            preferred_element_type=jnp.float32)
    m_tile = jnp.max(s, axis=0, keepdims=True)                    # (1, tk)
    m_new = jnp.maximum(m_run[...], m_tile)
    scale = jnp.exp(m_run[...] - m_new)                            # 0 on first tile
    d_run[...] = d_run[...] * scale + jnp.sum(jnp.exp(s - m_new),
                                              axis=0, keepdims=True)
    m_run[...] = m_new

    @pl.when(qi == nq - 1)
    def _finalize():
        m_ref[...] = m_run[...].reshape(m_ref.shape)
        # exact reciprocal (computed once per column; negligible cost, avoids
        # the approx-reciprocal error flagged in review).
        r_ref[...] = (1.0 / d_run[...]).reshape(r_ref.shape)


def _attn_ff_kernel(q_ref, k_ref, v_ref, m_ref, r_ref,
                    wff_ref, bff_ref, wo_ref, bo_ref,
                    y_ref, acc_ref):
    """Streamed attention (key tiles inner) + feed-forward + output projection
    for one (tq, H) query tile.  Attention accumulator is a (tq, H) f32 scratch,
    the FF intermediate is only (tq, F)."""
    ki = pl.program_id(2)
    nk = pl.num_programs(2)

    @pl.when(ki == 0)
    def _init():
        acc_ref[...] = jnp.zeros_like(acc_ref)

    s = jax.lax.dot_general(q_ref[...], k_ref[...],
                            dimension_numbers=(((1,), (1,)), ((), ())),
                            preferred_element_type=jnp.float32)    # (tq, tk) f32
    # softmax over the query axis: per-key-column max / reciprocal-denominator
    # (computed over ALL queries by the stats kernel), keys on the lane axis.
    p = jnp.exp(s - m_ref[0]) * r_ref[0]                           # (tq, tk) f32
    acc_ref[...] += jnp.dot(p.astype(v_ref.dtype), v_ref[...],
                            preferred_element_type=jnp.float32)    # (tq, H) f32

    @pl.when(ki == nk - 1)
    def _finalize():
        a = acc_ref[...].astype(wff_ref.dtype)                     # bf16 MXU feed
        h = jnp.dot(a, wff_ref[...],
                    preferred_element_type=jnp.float32) + bff_ref[...]   # (tq, F)
        y = jnp.dot(h.astype(wo_ref.dtype), wo_ref[...],
                    preferred_element_type=jnp.float32) + bo_ref[...]    # (tq, H)
        y_ref[...] = y.astype(y_ref.dtype)


# -----------------------------------------------------------------------------
# wrappers
# -----------------------------------------------------------------------------

def _pick_tile(seq_len: int) -> int:
    # 256 matches the v6e/v7x 2x256^2 MXU output geometry, 128 the v5e 4x128^2
    # MXU.  Never 512: no extra MXU utilization, ~3x the live (tq, tk) f32
    # intermediates (scores/exp/probabilities).
    for t in (256, 128, 64, 32, 16, 8):
        if seq_len % t == 0:
            return t
    return seq_len


def _vmem_limit(est_bytes: int) -> int:
    # estimate * headroom, clamped to [16 MiB, 64 MiB] (64 MiB == v7x physical).
    return int(min(max(int(est_bytes * 1.5) + (4 << 20), 16 << 20), 64 << 20))


def decoder_layer_forward(x, params, *, q_tile=None, k_tile=None,
                          compute_dtype=jnp.bfloat16, interpret=False):
    """One fused DecodlerLayer forward (prefill).  Returns (y, k_cache, v_cache)."""
    B, S, D = x.shape
    wq, bq, wk, bk, wv, bv, wff, bff, wo, bo = params
    H = wq.shape[1]
    F = wff.shape[1]

    tq = _pick_tile(S) if q_tile is None else q_tile
    tk = _pick_tile(S) if k_tile is None else k_tile
    assert S % tq == 0, f"query tile {tq} must divide sequence length {S}"
    assert S % tk == 0, f"key tile {tk} must divide sequence length {S}"
    nq, nk = S // tq, S // tk

    cd = np.dtype(compute_dtype)
    bp = cd.itemsize
    # bf16 MXU operands: cast activations + weights once at the call boundary.
    xc = x.astype(cd)
    wq, bq, wk, bk, wv, bv, wff, bff, wo, bo = (
        a.astype(cd) for a in (wq, bq, wk, bk, wv, bv, wff, bff, wo, bo))

    # -------------------- kernel 1: q/k/v projections --------------------
    w2 = lambda b, si: (0, 0)
    proj_bytes = (2 * tq * D * bp + 3 * (D * H + H) * bp + 6 * tq * H * bp)
    q, kc, vc = pl.pallas_call(
        _qkv_proj_kernel,
        out_shape=(jax.ShapeDtypeStruct((B, S, H), cd),
                   jax.ShapeDtypeStruct((B, S, H), cd),
                   jax.ShapeDtypeStruct((B, S, H), cd)),
        grid_spec=pltpu.PrefetchScalarGridSpec(
            num_scalar_prefetch=0,
            grid=(B, nq),
            in_specs=[
                pl.BlockSpec((None, tq, D), lambda b, si: (b, si, 0)),
                pl.BlockSpec((D, H), w2, pipeline_mode=pl.Buffered(1)),
                pl.BlockSpec((1, H), w2, pipeline_mode=pl.Buffered(1)),
                pl.BlockSpec((D, H), w2, pipeline_mode=pl.Buffered(1)),
                pl.BlockSpec((1, H), w2, pipeline_mode=pl.Buffered(1)),
                pl.BlockSpec((D, H), w2, pipeline_mode=pl.Buffered(1)),
                pl.BlockSpec((1, H), w2, pipeline_mode=pl.Buffered(1)),
            ],
            out_specs=(
                pl.BlockSpec((None, tq, H), lambda b, si: (b, si, 0)),
                pl.BlockSpec((None, tq, H), lambda b, si: (b, si, 0)),
                pl.BlockSpec((None, tq, H), lambda b, si: (b, si, 0)),
            ),
        ),
        compiler_params=pltpu.CompilerParams(
            dimension_semantics=("parallel", "parallel"),
            vmem_limit_bytes=_vmem_limit(proj_bytes)),
        interpret=interpret,
    )(xc, wq, bq, wk, bk, wv, bv)

    # ------------- kernel 2: per-key-column softmax stats (two-pass) -------------
    stat_shape = (B, nk, 1, tk)       # keys on the lane axis, one row per key tile
    stats_bytes = (2 * tq * H * bp + 2 * tk * H * bp + 6 * 8 * max(tk, 128) * 4)
    m, r = pl.pallas_call(
        _colstats_kernel,
        out_shape=(jax.ShapeDtypeStruct(stat_shape, jnp.float32),
                   jax.ShapeDtypeStruct(stat_shape, jnp.float32)),
        grid_spec=pltpu.PrefetchScalarGridSpec(
            num_scalar_prefetch=0,
            grid=(B, nk, nq),
            in_specs=[
                pl.BlockSpec((None, tq, H), lambda b, ki, qi: (b, qi, 0)),
                pl.BlockSpec((None, tk, H), lambda b, ki, qi: (b, ki, 0)),
            ],
            out_specs=(
                pl.BlockSpec((None, 1, 1, tk), lambda b, ki, qi: (b, ki, 0, 0)),
                pl.BlockSpec((None, 1, 1, tk), lambda b, ki, qi: (b, ki, 0, 0)),
            ),
            scratch_shapes=[pltpu.VMEM((1, tk), jnp.float32),
                            pltpu.VMEM((1, tk), jnp.float32)],
        ),
        compiler_params=pltpu.CompilerParams(
            dimension_semantics=("parallel", "parallel", "arbitrary"),
            vmem_limit_bytes=_vmem_limit(stats_bytes)),
        interpret=interpret,
    )(q, kc)

    # ------------- kernel 3: attention + feed-forward + output projection -------------
    w3 = lambda b, qi, ki: (0, 0)
    attn_bytes = (2 * tq * H * bp + 4 * tk * H * bp + 4 * 8 * max(tk, 128) * 4
                  + (H * F + F + F * H + H) * bp + 2 * tq * H * bp + tq * H * 4)
    y = pl.pallas_call(
        _attn_ff_kernel,
        out_shape=jax.ShapeDtypeStruct((B, S, H), cd),
        grid_spec=pltpu.PrefetchScalarGridSpec(
            num_scalar_prefetch=0,
            grid=(B, nq, nk),
            in_specs=[
                pl.BlockSpec((None, tq, H), lambda b, qi, ki: (b, qi, 0)),
                pl.BlockSpec((None, tk, H), lambda b, qi, ki: (b, ki, 0)),
                pl.BlockSpec((None, tk, H), lambda b, qi, ki: (b, ki, 0)),
                pl.BlockSpec((None, 1, 1, tk), lambda b, qi, ki: (b, ki, 0, 0)),
                pl.BlockSpec((None, 1, 1, tk), lambda b, qi, ki: (b, ki, 0, 0)),
                pl.BlockSpec((H, F), w3, pipeline_mode=pl.Buffered(1)),
                pl.BlockSpec((1, F), w3, pipeline_mode=pl.Buffered(1)),
                pl.BlockSpec((F, H), w3, pipeline_mode=pl.Buffered(1)),
                pl.BlockSpec((1, H), w3, pipeline_mode=pl.Buffered(1)),
            ],
            out_specs=pl.BlockSpec((None, tq, H), lambda b, qi, ki: (b, qi, 0)),
            scratch_shapes=[pltpu.VMEM((tq, H), jnp.float32)],
        ),
        compiler_params=pltpu.CompilerParams(
            dimension_semantics=("parallel", "parallel", "arbitrary"),
            vmem_limit_bytes=_vmem_limit(attn_bytes)),
        interpret=interpret,
    )(q, kc, vc, m, r, wff, bff, wo, bo)

    return y, kc, vc


def toy_llama_forward(x, layer_params, *, q_tile=None, k_tile=None,
                      compute_dtype=jnp.bfloat16, interpret=False):
    """Prefill forward of the layer stack.  Returns (y, [(k, v), ...])."""
    kv_cache = []
    for params in layer_params:
        x, k, v = decoder_layer_forward(
            x, params, q_tile=q_tile, k_tile=k_tile,
            compute_dtype=compute_dtype, interpret=interpret)
        kv_cache.append((k, v))
    return x, kv_cache


# ----------------------------- pure-JAX reference ----------------------------

def _layer_reference(x, params):
    wq, bq, wk, bk, wv, bv, wff, bff, wo, bo = params
    q = x @ wq + bq
    k = x @ wk + bk
    v = x @ wv + bv
    scores = jnp.einsum("bqh,bkh->bqk", q, k)
    p = jax.nn.softmax(scores, axis=1)          # dim=1 == query axis, as in the module
    a = jnp.einsum("bqk,bkh->bqh", p, v)
    h = a @ wff + bff
    return h @ wo + bo, (k, v)


def toy_llama_reference(x, layer_params):
    kv_cache = []
    for params in layer_params:
        x, kv = _layer_reference(x, params)
        kv_cache.append(kv)
    return x, kv_cache


# ------------------------------------ demo -----------------------------------

if __name__ == "__main__":
    B, S, D, H, F, L = 2, 32, 32, 32, 64, 2     # input_size == hidden_size so layers stack
    key = jax.random.PRNGKey(0)
    keys = jax.random.split(key, 1 + 10 * L)

    def bf16_rt(a):
        # round-trip through bf16 so the kernel's boundary cast is exact and the
        # f32 reference sees identical values.
        return a.astype(jnp.bfloat16).astype(jnp.float32)

    x = bf16_rt(jax.random.normal(keys[0], (B, S, D), jnp.float32))

    def nrm(k, shape, scale):
        return bf16_rt(jax.random.normal(k, shape, jnp.float32) * scale)

    layer_params = []
    idx = 1
    for _ in range(L):
        wq = nrm(keys[idx + 0], (D, H), 0.5 / np.sqrt(D))
        bq = nrm(keys[idx + 1], (1, H), 0.1)
        wk = nrm(keys[idx + 2], (D, H), 0.5 / np.sqrt(D))
        bk = nrm(keys[idx + 3], (1, H), 0.1)
        wv = nrm(keys[idx + 4], (D, H), 1.0 / np.sqrt(D))
        bv = nrm(keys[idx + 5], (1, H), 0.1)
        wff = nrm(keys[idx + 6], (H, F), 1.0 / np.sqrt(H))
        bff = nrm(keys[idx + 7], (1, F), 0.1)
        wo = nrm(keys[idx + 8], (F, H), 1.0 / np.sqrt(F))
        bo = nrm(keys[idx + 9], (1, H), 0.1)
        layer_params.append((wq, bq, wk, bk, wv, bv, wff, bff, wo, bo))
        idx += 10

    # q_tile=8, k_tile=8 -> 4 query tiles x 4 key tiles per batch row: exercises
    # the two-pass column-softmax streaming and every pl.when init/finalize path.
    y, kv = toy_llama_forward(x, layer_params, q_tile=8, k_tile=8)
    y = jax.block_until_ready(y)

    y_ref, kv_ref = toy_llama_reference(x, layer_params)

    def f32np(a):
        return np.asarray(jnp.asarray(a, jnp.float32))

    # bf16 MXU operands + bf16 outputs -> looser tolerance than the f32 version.
    np.testing.assert_allclose(f32np(y), f32np(y_ref), rtol=5e-2, atol=5e-2)
    for (k_p, v_p), (k_r, v_r) in zip(kv, kv_ref):
        np.testing.assert_allclose(f32np(k_p), f32np(k_r), rtol=5e-2, atol=5e-2)
        np.testing.assert_allclose(f32np(v_p), f32np(v_r), rtol=5e-2, atol=5e-2)

    print("KERNEL_OK")
</pallas_src>

<mosaic_0001>
module attributes {stable_mosaic.version = 11 : i64} {
  func.func @_qkv_proj_kernel(%arg0: i32, %arg1: i32, %arg2: memref<1x8x32xbf16, #tpu.memory_space<vmem>>, %arg3: memref<32x32xbf16, #tpu.memory_space<vmem>>, %arg4: memref<1x32xbf16, #tpu.memory_space<vmem>>, %arg5: memref<32x32xbf16, #tpu.memory_space<vmem>>, %arg6: memref<1x32xbf16, #tpu.memory_space<vmem>>, %arg7: memref<32x32xbf16, #tpu.memory_space<vmem>>, %arg8: memref<1x32xbf16, #tpu.memory_space<vmem>>, %arg9: memref<1x8x32xbf16, #tpu.memory_space<vmem>>, %arg10: memref<1x8x32xbf16, #tpu.memory_space<vmem>>, %arg11: memref<1x8x32xbf16, #tpu.memory_space<vmem>>) attributes {dimension_semantics = [#tpu.dimension_semantics<parallel>, #tpu.dimension_semantics<parallel>], iteration_bounds = array<i64: 2, 4>, scalar_prefetch = 0 : i64, scratch_operands = 0 : i64, tpu.core_type = #tpu.core_type<tc>, window_params = [{transform_indices = @transform_0, window_bounds = array<i64: 1, 8, 32>}, {pipeline_mode = #tpu.pipeline_mode<synchronous>, transform_indices = @transform_1, window_bounds = array<i64: 32, 32>}, {pipeline_mode = #tpu.pipeline_mode<synchronous>, transform_indices = @transform_2, window_bounds = array<i64: 1, 32>}, {pipeline_mode = #tpu.pipeline_mode<synchronous>, transform_indices = @transform_3, window_bounds = array<i64: 32, 32>}, {pipeline_mode = #tpu.pipeline_mode<synchronous>, transform_indices = @transform_4, window_bounds = array<i64: 1, 32>}, {pipeline_mode = #tpu.pipeline_mode<synchronous>, transform_indices = @transform_5, window_bounds = array<i64: 32, 32>}, {pipeline_mode = #tpu.pipeline_mode<synchronous>, transform_indices = @transform_6, window_bounds = array<i64: 1, 32>}, {transform_indices = @transform_7, window_bounds = array<i64: 1, 8, 32>}, {transform_indices = @transform_8, window_bounds = array<i64: 1, 8, 32>}, {transform_indices = @transform_9, window_bounds = array<i64: 1, 8, 32>}]} {
    %c0 = arith.constant 0 : index
    %c0_0 = arith.constant 0 : index
    %c0_1 = arith.constant 0 : index
    %0 = vector.load %arg2[%c0, %c0_0, %c0_1] : memref<1x8x32xbf16, #tpu.memory_space<vmem>>, vector<1x8x32xbf16>
    %1 = vector.shape_cast %0 : vector<1x8x32xbf16> to vector<8x32xbf16>
    %c0_2 = arith.constant 0 : index
    %c0_3 = arith.constant 0 : index
    %2 = vector.load %arg3[%c0_2, %c0_3] : memref<32x32xbf16, #tpu.memory_space<vmem>>, vector<32x32xbf16>
    %cst = arith.constant dense<0.000000e+00> : vector<8x32xf32>
    %3 = tpu.matmul %1, %2, %cst {dimension_numbers = #tpu.dot_dimension_numbers<[1], [0], [0], [1], [0, 0, 1, 1], [], []>} : vector<8x32xbf16>, vector<32x32xbf16>, vector<8x32xf32> -> vector<8x32xf32>
    %c0_4 = arith.constant 0 : index
    %c0_5 = arith.constant 0 : index
    %4 = vector.load %arg4[%c0_4, %c0_5] : memref<1x32xbf16, #tpu.memory_space<vmem>>, vector<1x32xbf16>
    %5 = arith.extf %4 : vector<1x32xbf16> to vector<1x32xf32>
    %6 = vector.broadcast %5 : vector<1x32xf32> to vector<8x32xf32>
    %7 = arith.addf %3, %6 : vector<8x32xf32>
    %c0_6 = arith.constant 0 : index
    %c0_7 = arith.constant 0 : index
    %8 = vector.load %arg5[%c0_6, %c0_7] : memref<32x32xbf16, #tpu.memory_space<vmem>>, vector<32x32xbf16>
    %cst_8 = arith.constant dense<0.000000e+00> : vector<8x32xf32>
    %9 = tpu.matmul %1, %8, %cst_8 {dimension_numbers = #tpu.dot_dimension_numbers<[1], [0], [0], [1], [0, 0, 1, 1], [], []>} : vector<8x32xbf16>, vector<32x32xbf16>, vector<8x32xf32> -> vector<8x32xf32>
    %c0_9 = arith.constant 0 : index
    %c0_10 = arith.constant 0 : index
    %10 = vector.load %arg6[%c0_9, %c0_10] : memref<1x32xbf16, #tpu.memory_space<vmem>>, vector<1x32xbf16>
    %11 = arith.extf %10 : vector<1x32xbf16> to vector<1x32xf32>
    %12 = vector.broadcast %11 : vector<1x32xf32> to vector<8x32xf32>
    %13 = arith.addf %9, %12 : vector<8x32xf32>
    %c0_11 = arith.constant 0 : index
    %c0_12 = arith.constant 0 : index
    %14 = vector.load %arg7[%c0_11, %c0_12] : memref<32x32xbf16, #tpu.memory_space<vmem>>, vector<32x32xbf16>
    %cst_13 = arith.constant dense<0.000000e+00> : vector<8x32xf32>
    %15 = tpu.matmul %1, %14, %cst_13 {dimension_numbers = #tpu.dot_dimension_numbers<[1], [0], [0], [1], [0, 0, 1, 1], [], []>} : vector<8x32xbf16>, vector<32x32xbf16>, vector<8x32xf32> -> vector<8x32xf32>
    %c0_14 = arith.constant 0 : index
    %c0_15 = arith.constant 0 : index
    %16 = vector.load %arg8[%c0_14, %c0_15] : memref<1x32xbf16, #tpu.memory_space<vmem>>, vector<1x32xbf16>
    %17 = arith.extf %16 : vector<1x32xbf16> to vector<1x32xf32>
    %18 = vector.broadcast %17 : vector<1x32xf32> to vector<8x32xf32>
    %19 = arith.addf %15, %18 : vector<8x32xf32>
    %20 = arith.truncf %7 : vector<8x32xf32> to vector<8x32xbf16>
    %c0_16 = arith.constant 0 : index
    %c0_17 = arith.constant 0 : index
    %c0_18 = arith.constant 0 : index
    %21 = vector.load %arg9[%c0_16, %c0_17, %c0_18] : memref<1x8x32xbf16, #tpu.memory_space<vmem>>, vector<1x8x32xbf16>
    %22 = vector.shape_cast %21 : vector<1x8x32xbf16> to vector<8x32xbf16>
    %23 = vector.shape_cast %20 : vector<8x32xbf16> to vector<1x8x32xbf16>
    tpu.vector_store %arg9[%c0_16, %c0_17, %c0_18], %23 {strides = array<i32>} : memref<1x8x32xbf16, #tpu.memory_space<vmem>>, vector<1x8x32xbf16>,
    %24 = arith.truncf %13 : vector<8x32xf32> to vector<8x32xbf16>
    %c0_19 = arith.constant 0 : index
    %c0_20 = arith.constant 0 : index
    %c0_21 = arith.constant 0 : index
    %25 = vector.load %arg10[%c0_19, %c0_20, %c0_21] : memref<1x8x32xbf16, #tpu.memory_space<vmem>>, vector<1x8x32xbf16>
    %26 = vector.shape_cast %25 : vector<1x8x32xbf16> to vector<8x32xbf16>
    %27 = vector.shape_cast %24 : vector<8x32xbf16> to vector<1x8x32xbf16>
    tpu.vector_store %arg10[%c0_19, %c0_20, %c0_21], %27 {strides = array<i32>} : memref<1x8x32xbf16, #tpu.memory_space<vmem>>, vector<1x8x32xbf16>,
    %28 = arith.truncf %19 : vector<8x32xf32> to vector<8x32xbf16>
    %c0_22 = arith.constant 0 : index
    %c0_23 = arith.constant 0 : index
    %c0_24 = arith.constant 0 : index
    %29 = vector.load %arg11[%c0_22, %c0_23, %c0_24] : memref<1x8x32xbf16, #tpu.memory_space<vmem>>, vector<1x8x32xbf16>
    %30 = vector.shape_cast %29 : vector<1x8x32xbf16> to vector<8x32xbf16>
    %31 = vector.shape_cast %28 : vector<8x32xbf16> to vector<1x8x32xbf16>
    tpu.vector_store %arg11[%c0_22, %c0_23, %c0_24], %31 {strides = array<i32>} : memref<1x8x32xbf16, #tpu.memory_space<vmem>>, vector<1x8x32xbf16>,
    return
  }
  func.func @transform_0(%arg0: i32, %arg1: i32) -> (i32, i32, i32) {
    %c0_i32 = arith.constant 0 : i32
    %c0_i32_0 = arith.constant 0 : i32
    return %arg0, %arg1, %c0_i32 : i32, i32, i32
  }
  func.func @transform_1(%arg0: i32, %arg1: i32) -> (i32, i32) {
    %c0_i32 = arith.constant 0 : i32
    %c0_i32_0 = arith.constant 0 : i32
    %c0_i32_1 = arith.constant 0 : i32
    return %c0_i32, %c0_i32_0 : i32, i32
  }
  func.func @transform_2(%arg0: i32, %arg1: i32) -> (i32, i32) {
    %c0_i32 = arith.constant 0 : i32
    %c0_i32_0 = arith.constant 0 : i32
    %c0_i32_1 = arith.constant 0 : i32
    return %c0_i32, %c0_i32_0 : i32, i32
  }
  func.func @transform_3(%arg0: i32, %arg1: i32) -> (i32, i32) {
    %c0_i32 = arith.constant 0 : i32
    %c0_i32_0 = arith.constant 0 : i32
    %c0_i32_1 = arith.constant 0 : i32
    return %c0_i32, %c0_i32_0 : i32, i32
  }
  func.func @transform_4(%arg0: i32, %arg1: i32) -> (i32, i32) {
    %c0_i32 = arith.constant 0 : i32
    %c0_i32_0 = arith.constant 0 : i32
    %c0_i32_1 = arith.constant 0 : i32
    return %c0_i32, %c0_i32_0 : i32, i32
  }
  func.func @transform_5(%arg0: i32, %arg1: i32) -> (i32, i32) {
    %c0_i32 = arith.constant 0 : i32
    %c0_i32_0 = arith.constant 0 : i32
    %c0_i32_1 = arith.constant 0 : i32
    return %c0_i32, %c0_i32_0 : i32, i32
  }
  func.func @transform_6(%arg0: i32, %arg1: i32) -> (i32, i32) {
    %c0_i32 = arith.constant 0 : i32
    %c0_i32_0 = arith.constant 0 : i32
    %c0_i32_1 = arith.constant 0 : i32
    return %c0_i32, %c0_i32_0 : i32, i32
  }
  func.func @transform_7(%arg0: i32, %arg1: i32) -> (i32, i32, i32) {
    %c0_i32 = arith.constant 0 : i32
    %c0_i32_0 = arith.constant 0 : i32
    return %arg0, %arg1, %c0_i32 : i32, i32, i32
  }
  func.func @transform_8(%arg0: i32, %arg1: i32) -> (i32, i32, i32) {
    %c0_i32 = arith.constant 0 : i32
    %c0_i32_0 = arith.constant 0 : i32
    return %arg0, %arg1, %c0_i32 : i32, i32, i32
  }
  func.func @transform_9(%arg0: i32, %arg1: i32) -> (i32, i32, i32) {
    %c0_i32 = arith.constant 0 : i32
    %c0_i32_0 = arith.constant 0 : i32
    return %arg0, %arg1, %c0_i32 : i32, i32, i32
  }
}

</mosaic_0001>

<bundles_post_ra>
// kernel: tpu_custom_call.1
= control target key start
LH: loop header
LB: loop body
LE: loop exit
PB: predicated region body
PF: predicated region fallthrough
CT: control target
= control target key end

     0   :  { %s1708_s0 = inlined_call_operand.hbm [shape: bf16[2,32,32], index: 0, kind: input, shape index: {}]   ;;  %s1709_s1 = inlined_call_operand.hbm [shape: bf16[32,32], index: 1, kind: input, shape index: {}]   ;;  %s1710_s2 = inlined_call_operand.vmem [shape: bf16[1,32], index: 2, kind: input, shape index: {}]   ;;  %s1711_s3 = inlined_call_operand.hbm [shape: bf16[32,32], index: 3, kind: input, shape index: {}]   ;;  %s1712_s4 = inlined_call_operand.vmem [shape: bf16[1,32], index: 4, kind: input, shape index: {}]   ;;  %s1713_s5 = inlined_call_operand.vmem [shape: bf16[32,32], index: 5, kind: input, shape index: {}]   ;;  %s1714_s6 = inlined_call_operand.vmem [shape: bf16[1,32], index: 6, kind: input, shape index: {}]   ;;  %s1715_s7 = inlined_call_operand.hbm [shape: bf16[2,32,32], index: 7, kind: output, shape index: {0}]   ;;  %s1716_s8 = inlined_call_operand.hbm [shape: bf16[2,32,32], index: 8, kind: output, shape index: {1}]   ;;  %s1717_s9 = inlined_call_operand.hbm [shape: bf16[2,32,32], index: 9, kind: output, shape index: {2}]  }
   0x1   :  { %1730 = sst [smem:[#allocation20_spill]] %s1709_s1 }
   0x2   :  { %1731 = sst [smem:[#allocation21_spill]] %s1711_s3 }
   0x3   :  { %1732 = sst [smem:[#allocation22_spill]] %s1714_s6 }
   0x4   :  { %1733 = sst [smem:[#allocation23_spill]] %s1715_s7 }
   0x5   :  { %1734 = sst [smem:[#allocation24_spill]] %s1716_s8 }
   0x6   :  { %1735 = sst [smem:[#allocation25_spill]] %s1717_s9 }
   0x7   :  { %15 = vsyncpa [#allocation3], 0 }
   0x8   :  { %17 = vsyncpa [#allocation3 + $0x1], 0 }
   0x9   :  { %18 = vsyncpa [#allocation6], 0 }
   0xa   :  { %19 = vsyncpa [#allocation4], 0 }
   0xb   :  { %21 = vsyncpa [#allocation4 + $0x1], 0 }
   0xc   :  { %22 = vsyncpa [#allocation10], 0 }
   0xd   :  { %24 = vsyncpa [#allocation10 + $0x1], 0  ;;  %s1339_s30 = smov 0   ;;  %s1341_s10 = smov 0  }
   0xe   :  { %s1343_s11 = smov 0   ;;  %s1345_s12 = smov 0  }
   0xf   :  { %s1347_s13 = smov 0   ;;  %s1349_s14 = smov 0  }
  0x10   :  { %s1351_s15 = smov 0   ;;  %s1353_s16 = smov 0  }
  0x11 LB: > { %1736 = sst [smem:[#allocation16_spill]] %s1249_s30  ;;  %s1380_s17 = sadd.s32 4294967295, %s1277_s16   ;;  %s1277_s16 = sphi %s1353_s16, %s30_s16   ;;  %s1273_s15 = sphi %s1351_s15, %s1770_s15   ;;  %s1269_s14 = sphi %s1349_s14, %s1769_s14   ;;  %s1265_s13 = sphi %s1347_s13, %s1768_s13   ;;  %s1261_s12 = sphi %s1345_s12, %s1767_s12   ;;  %s1257_s11 = sphi %s1343_s11, %s1766_s11   ;;  %s1253_s10 = sphi %s1341_s10, %s1765_s10   ;;  %s1249_s30 = sphi %s1339_s30, %s1764_s30  }
  0x12   : > { %s1718_s18 = sadd.s32 4294967294, %s1277_s16   ;;  %p64_p0 = scmp.ne.s32.totalorder %s1253_s10, %s1249_s30 }
  0x13   : > { %p1721_p1 = scmp.eq.s32.totalorder %s1380_s17, 0  ;;  %p222_p2 = scmp.eq.s32.totalorder %s1718_s18, 7 }
  0x14   : > { %p843_p4 = scmp.ge.s32.totalorder %s1277_s16, 1  ;;  %p285_p6 = scmp.lt.s32.totalorder %s1277_s16, 9 }
  0x15   : > { %p1390_p3 = por %p1721_p1, %p64_p0  ;;  %p1395_p5 = por %p222_p2, %p64_p0 }
  0x16   : > { %p1400_p7 = pnand %p843_p4, %p285_p6  ;;  %s1279_s22 = smov [#allocation5]  }
  0x17   : > { %s1737_s19 = scalar_select %p1390_p3, 1, 0 }
  0x18   : > { %s1738_s20 = scalar_select %p1395_p5, 1, 0 }
  0x19   : > { %s1740_s21 = scalar_select %p1400_p7, 1, 0 }
  0x1a   : > { %1739 = sst [smem:[#allocation17_spill]] %s1738_s20  ;;  %s297_s23 = sshll.u32 %s1279_s22, 4  ;;  %s298_s23 = int_to_ptr.vmem [resolvable:$true] %s297_s23 }
  0x1b   : > { %p926_p8 = pneg %p1400_p7  ;;  %s1280_s25 = smov [#allocation7]  }
  0x1c   : > { %s313_s26 = sshll.u32 %s1280_s25, 4  ;;  %s1742_s1 = sld [smem:[#allocation20_spill]]  ;;  %s1412_s26 = int_to_ptr.vmem [resolvable:$true] %s313_s26 }
  0x1d   : > { %p1408_p9 = pnand %p926_p8, %p1721_p1 }
  0x1f   : > { %p1031_p11 = pneg %p1408_p9 }
  0x22   : > { %s1029_s29 = scalar_lea.hbm %s1742_s1, 256 }
  0x23   : > { %p1030_p10 = scmp.ne.s32.totalorder %s1742_s1, %s1029_s29  ;;  %p1036_p0 = scmp.lt.u32.totalorder %s1029_s29, %s1742_s1 }
  0x25   : > { %p1032_p12 = pnand %p1031_p11, %p1030_p10 }
  0x27   : > { %p1033_p13 = pneg %p1032_p12 }
  0x29   : > { %p1038_p2 = pnand %p1036_p0, %p1033_p13 }
  0x2b   : > { %1041 = shalt.err (!%p1038_p2)
}
  0x2c   : > { %s1042_s25 = scalar_lea.vmem %s298_s23, 256  ;;  %p1050_p1 = scmp.lt.s32.totalorder %s298_s23, %s298_s23 }
  0x2d   : > { %p1043_p4 = scmp.ne.s32.totalorder %s298_s23, %s1042_s25  ;;  %p1051_p5 = scmp.lt.s32.totalorder %s1042_s25, %s1042_s25 }
  0x2f   : > { %p1045_p6 = pnand %p1043_p4, %p1031_p11  ;;  %p1052_p3 = por %p1051_p5, %p1050_p1 }
  0x31   : > { %p1046_p8 = pneg %p1045_p6 }
  0x33   : > { %p1053_p7 = pnand %p1052_p3, %p1046_p8 }
  0x35   : > { %1056 = shalt.err (!%p1053_p7)
}
  0x36   : > { %s1281_s18 = smov 64   ;;  %s1282_s27 = smov 4  }
  0x37   : > { %929 = dma.hbm_to_vmem [thread:$0]  (!%p1408_p9), %s1742_s1, 256, %s298_s23, [#allocation6], %s1281_s18, %s1281_s18, %s1282_s27  }
  0x38   : > { %s1743_s3 = sld [smem:[#allocation21_spill]] }
  0x3e   : > { %s1057_s22 = scalar_lea.hbm %s1743_s3, 256 }
  0x3f   : > { %p1058_p10 = scmp.ne.s32.totalorder %s1743_s3, %s1057_s22  ;;  %p1064_p5 = scmp.lt.u32.totalorder %s1057_s22, %s1743_s3 }
  0x41   : > { %p1060_p1 = pnand %p1058_p10, %p1031_p11 }
  0x43   : > { %p1061_p3 = pneg %p1060_p1 }
  0x45   : > { %p1066_p7 = pnand %p1064_p5, %p1061_p3 }
  0x47   : > { %1069 = shalt.err (!%p1066_p7)
}
  0x48   : > { %s1070_s23 = scalar_lea.vmem %s1412_s26, 256  ;;  %p1078_p2 = scmp.lt.s32.totalorder %s1412_s26, %s1412_s26 }
  0x49   : > { %p1071_p12 = scmp.ne.s32.totalorder %s1412_s26, %s1070_s23  ;;  %p1079_p4 = scmp.lt.s32.totalorder %s1070_s23, %s1070_s23 }
  0x4b   : > { %p1073_p13 = pnand %p1071_p12, %p1031_p11  ;;  %p1080_p6 = por %p1079_p4, %p1078_p2 }
  0x4d   : > { %p1074_p0 = pneg %p1073_p13 }
  0x4f   : > { %p1081_p8 = pnand %p1080_p6, %p1074_p0 }
  0x51   : > { %1084 = shalt.err (!%p1081_p8)
}
  0x52   : > { %932 = dma.hbm_to_vmem [thread:$0]  (!%p1408_p9), %s1743_s3, 256, %s1412_s26, [#allocation6], %s1281_s18, %s1281_s18, %s1282_s27  }
  0x53   : > { %p216_p11 = scmp.eq.s32.totalorder %s1380_s17, 7  ;;  %s39_s9 = sadd.s32 1, %s1269_s14 }
  0x54   : > { %p40_p10 = scmp.ge.s32.totalorder %s39_s9, 4  ;;  %s42_s24 = sadd.s32 1, %s1273_s15 }
  0x55   : > { %p58_p1 = scmp.ne.s32.totalorder %s1257_s11, %s1253_s10  ;;  %p59_p3 = scmp.eq.s32.totalorder %s1277_s16, 0 }
  0x56   : > { %s1772_s9 = smov (%p40_p10, %s39_s9), 0  ;;  %s1774_s24 = smov (!%p40_p10, %s42_s24), %s1273_s15 }
  0x57   : > { %1744 = sst [smem:[#allocation18_spill]] %s1772_s9  ;;  %s47_s30 = ssub.s32 %s1269_s14, %s1772_s9 }
  0x58   : > { %s51_s20 = sadd.s32 1, %s1257_s11  ;;  %p44_p5 = scmp.ge.s32.totalorder %s1774_s24, 2 }
  0x59   : > { %p1473_p7 = por %p216_p11, %p58_p1  ;;  %p1477_p9 = por %p59_p3, %p58_p1 }
  0x5a   : > { %s336_s27 = sand.u32 1, %s1257_s11   ;;  %s1776_s24 = smov (%p44_p5, %s1774_s24), 0 }
  0x5b   : > { %s1745_s26 = scalar_select %p1473_p7, 1, 0 }
  0x5c   : > { %p949_p12 = scmp.lt.s32.totalorder %s1277_s16, 8  ;;  %s847_s28 = sshll.u32 %s336_s27, 2 }
  0x5d   : > { %1746 = sst [smem:[#allocation19_spill]] %s1745_s26  ;;  %s46_s29 = ssub.s32 %s1273_s15, %s1776_s24 }
  0x5e   : > { %s48_s22 = sor.u32 %s47_s30, %s46_s29  ;;  %s848_s25 = sshll.u32 %s1273_s15, 2 }
  0x5f   : > { %p49_p13 = scmp.eq.s32.totalorder %s48_s22, 0  ;;  %s345_s23 = sadd.s32 %s1269_s14, %s848_s25 }
  0x60   : > { %s849_s7 = sshll.u32 %s345_s23, 6  ;;  %s340_s8 = scalar_lea.vmem [#allocation2], %s847_s28 }
  0x61   : > { %s349_s1 = sshll.u32 %s340_s8, 4  ;;  %s1495_s6 = scalar_lea.hbm %s1708_s0, %s849_s7  ;;  %s1497_s1 = int_to_ptr.vmem [resolvable:$true] %s349_s1 }
  0x62   : > { %s1490_s3 = scalar_select %p49_p13, %s1257_s11, %s51_s20  }
  0x63   : > { %p1503_p0 = pnand %p949_p12, %p1477_p9  ;;  %s337_s20 = scalar_lea.sflag [#allocation3], %s336_s27 }
  0x64   : > { %s1085_s28 = scalar_lea.hbm %s1495_s6, 64  ;;  %s1090_s18 = scalar_lea.hbm %s1708_s0, 512 }
  0x65   : > { %p1086_p2 = scmp.ne.s32.totalorder %s1495_s6, %s1085_s28  ;;  %p1087_p4 = pneg %p1503_p0 }
  0x66   : > { %p1091_p11 = scmp.lt.u32.totalorder %s1495_s6, %s1708_s0  ;;  %p1092_p10 = scmp.lt.u32.totalorder %s1090_s18, %s1085_s28 }
  0x67   : > { %p1088_p6 = pnand %p1087_p4, %p1086_p2  ;;  %p1094_p3 = scmp.lt.u32.totalorder %s1085_s28, %s1495_s6 }
  0x68   : > { %p1093_p1 = por %p1092_p10, %p1091_p11 }
  0x69   : > { %p1089_p8 = pneg %p1088_p6 }
  0x6a   : > { %p1095_p5 = por %p1094_p3, %p1093_p1 }
  0x6c   : > { %p1096_p9 = pnand %p1095_p5, %p1089_p8 }
  0x6e   : > { %1099 = shalt.err (!%p1096_p9)
}
  0x6f   : > { %s1100_s27 = scalar_lea.vmem %s1497_s1, 64  ;;  %s1283_s25 = smov [#allocation2]  }
  0x70   : > { %p1101_p12 = scmp.ne.s32.totalorder %s1497_s1, %s1100_s27  ;;  %s1105_s23 = sshll.u32 %s1283_s25, 4  ;;  %s1106_s23 = int_to_ptr.vmem [resolvable:$false] %s1105_s23 }
  0x71   : > { %s1107_s7 = scalar_lea.vmem %s1106_s23, 128  ;;  %p1108_p6 = scmp.lt.s32.totalorder %s1497_s1, %s1106_s23 }
  0x72   : > { %p1103_p13 = pnand %p1101_p12, %p1087_p4  ;;  %p1109_p11 = scmp.lt.s32.totalorder %s1107_s7, %s1100_s27 }
  0x74   : > { %p1104_p2 = pneg %p1103_p13  ;;  %p1110_p10 = por %p1109_p11, %p1108_p6 }
  0x76   : > { %p1111_p1 = pnand %p1110_p10, %p1104_p2 }
  0x78   : > { %1114 = shalt.err (!%p1111_p1)
}
  0x79   : > { %936 = dma.hbm_to_vmem [thread:$0]  (!%p1503_p0), %s1495_s6, 64, %s1497_s1, %s337_s20  }
  0x7a   : > { %p1749_p8 = scmp.ne.s32.totalorder %s1740_s21, 0 }
  0x7b   : > { %s1535_s8 = sand.u32 (!%p1749_p8), 1, %s1253_s10   ;;  %p1750_p4 = scmp.ne.s32.totalorder (!%p1749_p8), %s1737_s19, 0 }
  0x7c   : > { %358 = sbr.rel (%p1749_p8) target bundleno = 422 (0x1a6), region = 48  ;;  %s1538_s28 = sshll.u32 (!%p1749_p8), %s1535_s8, 2 }
  0x7d   : > { %s361_s9 = scalar_lea.sflag (!%p1749_p8), [#allocation3], %s1535_s8  ;;  %s364_s26 = scalar_lea.vmem (!%p1749_p8), [#allocation2], %s1538_s28 }
  0x83   : > { %1232 = dma.done.wait (%p1750_p4), %s361_s9, 64  }
  0x84   : > { %1234 = vsyncadd (%p1750_p4), %s361_s9, 4294967232  ;;  %p1751_p0 = scmp.eq.s32.totalorder %s1380_s17, 0 }
  0x86   : > { %1236 = dma.done.wait (%p1751_p0), [#allocation6], 512   ;;  %p1752_p3 = pmov %p1751_p0 }
  0x87   : > { %v1284_v0 = vmov 0.0   ;;  %vm1285_vm0 = vmmov 0   ;;  %v1023_v1 = vld [vmem:[#allocation5] sm:$0xff]   ;;  %v1024_v2 = vld [vmem:[#allocation5 + $0x8] sm:$0xff]   ;;  %v1025_v3 = vld [vmem:[#allocation7] sm:$0xff]   ;;  %vm441_vm1 = vcmask 261120   ;;  %v425_v8 = vlaneseq }
  0x88   : > { %1238 = vsyncadd (%p1752_p3), [#allocation6], 4294966784  ;;  %886 = vmatprep.subr.bf16.mxu0 %v1284_v0  ;;  %894 = vmatprep.subr.bf16.mxu1 %v1284_v0  ;;  %v1027_v4 = vld [vmem:[#allocation7 + $0x8] sm:$0xff]   ;;  %v1028_v7 = vld [vmem:[%s1713_s5 + $0x8] sm:$0xff]   ;;  %s869_s22 = sshll.u32 %s1265_s13, 2  ;;  %s1753_s7 = sld [smem:[#allocation22_spill]] }
  0x89   : > { %890 = vmatprep.mubr.msk.bf16.mxu0 %vm1285_vm0, %v1284_v0  ;;  %898 = vmatprep.mubr.msk.bf16.mxu1 %vm1285_vm0, %v1284_v0  ;;  %v418_v5 = vld [vmem:[%s364_s26] sm:$0xf]  ;;  %v426_v9 = vshrl.u32 %v425_v8, 7  ;;  %s638_s27 = sadd.s32 %s1261_s12, %s869_s22  ;;  %s402_s26 = scalar_lea.vmem [#allocation8], %s1538_s28  ;;  %vm610_vm2 = vcmask 257024  }
  0x8a   : > { %887 = vmatpush3.bf16.msra.mxu0 %v1023_v1  ;;  %895 = vmatpush3.bf16.msra.mxu1 %v1025_v3  ;;  %v1026_v6 = vld [vmem:[%s1713_s5] sm:$0xff]   ;;  %s1570_s9 = sshll.u32 %s638_s27, 6  ;;  %s642_s1 = sshll.u32 %s402_s26, 4  ;;  %s1583_s1 = int_to_ptr.vmem [resolvable:$true] %s642_s1 }
  0x8b   : > { %888 = vmatprep.subr.bf16.mxu0 %v1284_v0  ;;  %896 = vmatprep.subr.bf16.mxu1 %v1284_v0  ;;  %v423_v10 = vld [vmem:[%s1710_s2] sm:$0x1]  ;;  %v427_v13 = vsub.s32 0, %v426_v9  ;;  %s409_s12 = scalar_lea.vmem [#allocation9], %s1538_s28  ;;  %s1755_s20 = sld [smem:[#allocation23_spill]] }
  0x8c   : > { %v489_v11 = vld [vmem:[%s1712_s4] sm:$0x1]  ;;  %v424_v12 = vunpack.c.l.bf16 %v423_v10  ;;  %s657_s6 = sshll.u32 %s409_s12, 4  ;;  %s1756_s27 = sld [smem:[#allocation24_spill]]  ;;  %s1591_s6 = int_to_ptr.vmem [resolvable:$true] %s657_s6 }
  0x8d   : > { %v490_v14 = vunpack.c.l.bf16 %v489_v11  ;;  %s617_s23 = scalar_lea.sflag [#allocation4], %s1535_s8  ;;  %s1286_s21 = smov [#allocation8]  }
  0x8e   : > { %889 = vmatpush3.bf16.msra.mxu0 %v1024_v2  ;;  %897 = vmatpush3.bf16.msra.mxu1 %v1027_v4  ;;  %v428_v15 = vrot.slane %v424_v12, %v427_v13  ;;  %v551_v16 = vld [vmem:[%s1753_s7] sm:$0x1]  ;;  %s1115_s7 = scalar_lea.vmem %s1583_s1, 64  ;;  %s1119_s30 = sshll.u32 %s1286_s21, 4  ;;  %s1120_s30 = int_to_ptr.vmem [resolvable:$false] %s1119_s30 }
  0x8f   : > { %902 = vmatprep.subr.bf16.mxu0 %v1284_v0  ;;  %v494_v17 = vrot.slane %v490_v14, %v427_v13  ;;  %v552_v21 = vunpack.c.l.bf16 %v551_v16  ;;  %p1116_p5 = scmp.ne.s32.totalorder %s1583_s1, %s1115_s7  ;;  %s1121_s13 = scalar_lea.vmem %s1120_s30, 128 }
  0x90   : > { %p1122_p13 = scmp.lt.s32.totalorder %s1583_s1, %s1120_s30  ;;  %p1123_p2 = scmp.lt.s32.totalorder %s1121_s13, %s1115_s7 }
  0x91   : > { %891 = vmatmul.mubr.msk.bf16.vlgmr.msra.gmra.mrb[0].mxu0 %vm441_vm1, %v418_v5  ;;  %899 = vmatmul.mubr.msk.bf16.vlgmr.msra.gmra.mrb[0].mxu1 %vm441_vm1, %v418_v5  ;;  %s1581_s18 = scalar_lea.hbm %s1755_s20, %s1570_s9  ;;  %v556_v31 = vrot.slane %v552_v21, %v427_v13  ;;  %p1117_p9 = pnand %p1116_p5, %p1473_p7 }
  0x92   : > { %903 = vmatpush3.bf16.msra.mxu0 %v1026_v6  ;;  %906 = vmatprep.mubr.msk.bf16.mxu0 %vm1285_vm0, %v1284_v0  ;;  %s1589_s25 = scalar_lea.hbm %s1756_s27, %s1570_s9  ;;  %p1124_p6 = por %p1123_p2, %p1122_p13 }
  0x93   : > { %904 = vmatprep.subr.bf16.mxu0 %v1284_v0  ;;  %p1118_p12 = pneg %p1117_p9 }
  0x95   : > { %p1125_p11 = pnand %p1124_p6, %p1118_p12 }
  0x96   : > { %905 = vmatpush3.bf16.msra.mxu0 %v1028_v7 }
  0x99   : > { %907 = vmatmul.mubr.msk.bf16.vlgmr.msra.gmra.mrb[4].mxu0 %vm441_vm1, %v418_v5 }
 0x164   : > { %v479_v18 = vpop.f32.mrb[0].mxu0  ;;  %v541_v23 = vpop.f32.mrb[0].mxu1 }
 0x165   : > { %v480_v19 = vadd.f32 %v479_v18, %v428_v15  ;;  %v892_v20 = vpop.f32.mrb[1].mxu0  ;;  %v542_v26 = vadd.f32 %v541_v23, %v494_v17  ;;  %v900_v27 = vpop.f32.mrb[1].mxu1 }
 0x166   : > { %v482_v22 = vpop.f32.mrb[2].mxu0  ;;  %v544_v28 = vpop.f32.mrb[2].mxu1 }
 0x167   : > { %v609_v24 = vpack.c.bf16 %v480_v19, %v480_v19  ;;  %v893_v25 = vpop.f32.mrb[3].mxu0  ;;  %v612_v29 = vpack.c.bf16 %v542_v26, %v542_v26  ;;  %v901_v30 = vpop.f32.mrb[3].mxu1 }
 0x169   : > { %611 = vst.msk [vmem:[%s402_s26] sm:$0xf] %vm610_vm2, %v609_v24 }
 0x16a   : > { %1128 = shalt.err (!%p1125_p11)
}
 0x16b   : > { %s1129_s8 = scalar_lea.hbm %s1581_s18, 64  ;;  %s1133_s22 = scalar_lea.hbm %s1755_s20, 512 }
 0x16c   : > { %p1130_p10 = scmp.ne.s32.totalorder %s1581_s18, %s1129_s8  ;;  %p1134_p4 = scmp.lt.u32.totalorder %s1581_s18, %s1755_s20 }
 0x16d   : > { %p1135_p0 = scmp.lt.u32.totalorder %s1133_s22, %s1129_s8  ;;  %p1137_p5 = scmp.lt.u32.totalorder %s1129_s8, %s1581_s18 }
 0x16e   : > { %p1131_p1 = pnand %p1130_p10, %p1473_p7 }
 0x16f   : > { %p1136_p3 = por %p1135_p0, %p1134_p4 }
 0x170   : > { %p1132_p8 = pneg %p1131_p1 }
 0x171   : > { %p1138_p9 = por %p1137_p5, %p1136_p3 }
 0x173   : > { %p1139_p12 = pnand %p1138_p9, %p1132_p8 }
 0x175   : > { %1142 = shalt.err (!%p1139_p12)
}
 0x176   : > { %920 = dma.vmem_to_hbm [thread:$0]  (%p1473_p7), %s1583_s1, 64, %s1581_s18, %s617_s23   ;;  %613 = vst.msk [vmem:[%s409_s12] sm:$0xf] %vm610_vm2, %v612_v29  ;;  %v603_v32 = vpop.f32.mrb[4].mxu0 }
 0x177   : > { %s416_s13 = scalar_lea.vmem [#allocation11], %s1538_s28  ;;  %s1757_s8 = sand.u32 1, %s1380_s17  }
 0x178   : > { %s1622_s7 = sshll.u32 %s416_s13, 4  ;;  %s1626_s26 = scalar_lea.sflag [#allocation10], %s1757_s8  ;;  %s673_s7 = int_to_ptr.vmem [resolvable:$true] %s1622_s7 }
 0x179   : > { %s1143_s29 = scalar_lea.vmem %s1591_s6, 64  ;;  %s1287_s22 = smov [#allocation9]  }
 0x17a   : > { %p1144_p13 = scmp.ne.s32.totalorder %s1591_s6, %s1143_s29  ;;  %s1147_s21 = sshll.u32 %s1287_s22, 4  ;;  %s1148_s21 = int_to_ptr.vmem [resolvable:$false] %s1147_s21 }
 0x17b   : > { %s1149_s1 = scalar_lea.vmem %s1148_s21, 128  ;;  %p1150_p11 = scmp.lt.s32.totalorder %s1591_s6, %s1148_s21 }
 0x17c   : > { %p1145_p2 = pnand %p1144_p13, %p1473_p7  ;;  %p1151_p10 = scmp.lt.s32.totalorder %s1149_s1, %s1143_s29 }
 0x17e   : > { %p1146_p6 = pneg %p1145_p2  ;;  %p1152_p1 = por %p1151_p10, %p1150_p11 }
 0x180   : > { %p1153_p8 = pnand %p1152_p1, %p1146_p6 }
 0x182   : > { %1156 = shalt.err (!%p1153_p8)
}
 0x183   : > { %s1157_s17 = scalar_lea.hbm %s1589_s25, 64  ;;  %s1161_s23 = scalar_lea.hbm %s1756_s27, 512 }
 0x184   : > { %p1158_p4 = scmp.ne.s32.totalorder %s1589_s25, %s1157_s17  ;;  %p1162_p5 = scmp.lt.u32.totalorder %s1589_s25, %s1756_s27 }
 0x185   : > { %p1163_p9 = scmp.lt.u32.totalorder %s1161_s23, %s1157_s17  ;;  %p1165_p13 = scmp.lt.u32.totalorder %s1157_s17, %s1589_s25 }
 0x186   : > { %p1159_p0 = pnand %p1158_p4, %p1473_p7 }
 0x187   : > { %p1164_p12 = por %p1163_p9, %p1162_p5 }
 0x188   : > { %p1160_p3 = pneg %p1159_p0 }
 0x189   : > { %p1166_p2 = por %p1165_p13, %p1164_p12 }
 0x18b   : > { %p1167_p6 = pnand %p1166_p2, %p1160_p3 }
 0x18d   : > { %1170 = shalt.err (!%p1167_p6)
}
 0x18e   : > { %921 = dma.vmem_to_hbm [thread:$0]  (%p1473_p7), %s1591_s6, 64, %s1589_s25, %s1626_s26   ;;  %v604_v33 = vadd.f32 %v603_v32, %v556_v31  ;;  %v908_v34 = vpop.f32.mrb[5].mxu0 }
 0x18f   : > { %v606_v35 = vpop.f32.mrb[6].mxu0  ;;  %s1758_s21 = sld [smem:[#allocation25_spill]]  ;;  %s1171_s17 = scalar_lea.vmem %s673_s7, 64 }
 0x190   : > { %v614_v36 = vpack.c.bf16 %v604_v33, %v604_v33  ;;  %v909_v37 = vpop.f32.mrb[7].mxu0  ;;  %p1172_p11 = scmp.ne.s32.totalorder %s673_s7, %s1171_s17  ;;  %s1288_s6 = smov [#allocation11]  }
 0x191   : > { %s1175_s25 = sshll.u32 %s1288_s6, 4  ;;  %s1176_s25 = int_to_ptr.vmem [resolvable:$false] %s1175_s25 }
 0x192   : > { %615 = vst.msk [vmem:[%s416_s13] sm:$0xf] %vm610_vm2, %v614_v36  ;;  %p1173_p10 = pnand %p1172_p11, %p1473_p7  ;;  %s1177_s12 = scalar_lea.vmem %s1176_s25, 128 }
 0x193   : > { %p1178_p8 = scmp.lt.s32.totalorder %s673_s7, %s1176_s25  ;;  %p1179_p4 = scmp.lt.s32.totalorder %s1177_s12, %s1171_s17 }
 0x194   : > { %p1174_p1 = pneg %p1173_p10 }
 0x195   : > { %s1654_s1 = scalar_lea.hbm %s1758_s21, %s1570_s9  ;;  %p1180_p0 = por %p1179_p4, %p1178_p8 }
 0x197   : > { %p1181_p3 = pnand %p1180_p0, %p1174_p1 }
 0x199   : > { %1184 = shalt.err (!%p1181_p3)
}
 0x19a   : > { %s1185_s28 = scalar_lea.hbm %s1654_s1, 64  ;;  %s1189_s18 = scalar_lea.hbm %s1758_s21, 512 }
 0x19b   : > { %p1186_p5 = scmp.ne.s32.totalorder %s1654_s1, %s1185_s28  ;;  %p1190_p13 = scmp.lt.u32.totalorder %s1654_s1, %s1758_s21 }
 0x19c   : > { %p1191_p2 = scmp.lt.u32.totalorder %s1189_s18, %s1185_s28  ;;  %p1193_p11 = scmp.lt.u32.totalorder %s1185_s28, %s1654_s1 }
 0x19d   : > { %p1187_p9 = pnand %p1186_p5, %p1473_p7 }
 0x19e   : > { %p1192_p6 = por %p1191_p2, %p1190_p13 }
 0x19f   : > { %p1188_p12 = pneg %p1187_p9 }
 0x1a0   : > { %p1194_p10 = por %p1193_p11, %p1192_p6 }
 0x1a2   : > { %p1195_p1 = pnand %p1194_p10, %p1188_p12 }
 0x1a4   : > { %1198 = shalt.err (!%p1195_p1)
}
 0x1a5   : > { %922 = dma.vmem_to_hbm [thread:$0]  (%p1473_p7), %s673_s7, 64, %s1654_s1, %s1626_s26  }
 0x1a6 PF: > { %s1759_s8 = sld [smem:[#allocation16_spill]]  ;;  %s1760_s29 = sld [smem:[#allocation17_spill]] }
 0x1a7   : > { %p952_p8 = scmp.ge.s32.totalorder %s1277_s16, 2 }
 0x1ac   : > { %s684_s22 = sand.u32 1, %s1759_s8   ;;  %p1761_p4 = scmp.ne.s32.totalorder %s1760_s29, 0 }
 0x1ad   : > { %s685_s17 = scalar_lea.sflag [#allocation4], %s684_s22 }
 0x1ae   : > { %p938_p0 = pnand %p952_p8, %p1761_p4 }
 0x1b0   : > { %1240 = dma.done.wait (!%p938_p0), %s685_s17, 64  }
 0x1b1   : > { %1242 = vsyncadd (!%p938_p0), %s685_s17, 4294967232  ;;  %s1762_s6 = sadd.s32 4294967294, %s1277_s16  }
 0x1b2   : > { %s693_s25 = sand.u32 1, %s1762_s6  }
 0x1b3   : > { %s694_s12 = scalar_lea.sflag [#allocation10], %s693_s25 }
 0x1b4   : > { %1244 = dma.done.wait (!%p938_p0), %s694_s12, 128  }
 0x1b5   : > { %1246 = vsyncadd (!%p938_p0), %s694_s12, 4294967168  ;;  %s30_s16 = sadd.s32 1, %s1277_s16   ;;  %s1763_s19 = sld [smem:[#allocation18_spill]] }
 0x1b6   : > { %p27_p7 = scmp.ge.s32.totalorder %s30_s16, 10   ;;  %s1764_s30 = smov %s1253_s10 }
 0x1b7   : > { %s1765_s10 = smov %s1257_s11  ;;  %s1766_s11 = smov %s1490_s3 }
 0x1b8   : > { %s1767_s12 = smov %s1269_s14  ;;  %s1768_s13 = smov %s1273_s15 }
 0x1b9   : > { %s1770_s15 = smov %s1776_s24  ;;  %29 = sbr.rel (!%p27_p7) target bundleno = 17 (0x11), region = 133 }
 0x1bb   : > { %s1769_s14 = smov %s1763_s19 }
 0x1c0   :  { %708 = vsyncpa [#allocation3], 1 }
 0x1c1   :  { %710 = vsyncpa [#allocation3 + $0x1], 1 }
 0x1c2   :  { %711 = vsyncpa [#allocation6], 1 }
 0x1c3   :  { %712 = vsyncpa [#allocation4], 1 }
 0x1c4   :  { %714 = vsyncpa [#allocation4 + $0x1], 1 }
 0x1c5   :  { %715 = vsyncpa [#allocation10], 1 }
 0x1c6   :  { %717 = vsyncpa [#allocation10 + $0x1], 1 }

</bundles_post_ra>
